<compile_context>
chip_gen: v7x
topology: tpu7x:2x2x1
jax: 0.10.0
libtpu: 0.0.40
codegen_flags: <defaults>
</compile_context>

<pallas_src>
import math

import jax
import jax.numpy as jnp
from jax.experimental import pallas as pl
from jax.experimental.pallas import tpu as pltpu

# Scoped-VMEM budget: above the v5e (16 MiB) / v6e,v7x (32 MiB) defaults so the
# tm=1024 fused-QKV working set (~17 MiB in bf16) pipelines at full depth, and
# well under v7x's 64 MiB physical VMEM.
_VMEM_LIMIT = 48 * 1024 * 1024


def _round_up(n, m):
    return ((n + m - 1) // m) * m


# ----------------------------------------------------------------------------
# Kernel 1: generic tiled linear  y = x @ W + b   (bf16 operands, f32 accum)
# ----------------------------------------------------------------------------
def _linear_kernel(x_ref, w_ref, b_ref, o_ref):
    o_ref[...] = (
        jnp.dot(x_ref[...], w_ref[...], preferred_element_type=jnp.float32)
        + b_ref[...]
    )


def pallas_linear(x2d, w, b, *, tm_max=1024):
    """y = x2d @ w + b, rows tiled in blocks of up to tm_max.

    tm_max=1024 keeps the working set inside scoped VMEM on all generations
    (drop to 512-768 on v5e, raise on v6e if vmem_limit_bytes is raised too).
    Ragged last row-block is handled by Pallas masking (no padding pass).
    """
    rows, d_in = x2d.shape
    d_out = w.shape[1]
    tm = min(_round_up(rows, 8), tm_max)
    return pl.pallas_call(
        _linear_kernel,
        out_shape=jax.ShapeDtypeStruct((rows, d_out), jnp.float32),
        grid=(pl.cdiv(rows, tm),),
        in_specs=[
            pl.BlockSpec((tm, d_in), lambda i: (i, 0)),
            pl.BlockSpec((d_in, d_out), lambda i: (0, 0)),   # resident weight
            pl.BlockSpec((1, d_out), lambda i: (0, 0)),      # resident bias
        ],
        out_specs=pl.BlockSpec((tm, d_out), lambda i: (i, 0)),
        compiler_params=pltpu.CompilerParams(
            dimension_semantics=("parallel",),
            vmem_limit_bytes=_VMEM_LIMIT),
    )(x2d.astype(jnp.bfloat16), w.astype(jnp.bfloat16),
      b.reshape(1, d_out).astype(jnp.float32))


# ----------------------------------------------------------------------------
# Kernel 2: fused Q/K/V projection (self-attention), three lane-dense outputs
# ----------------------------------------------------------------------------
def _qkv_kernel(x_ref, wq_ref, wk_ref, wv_ref, bq_ref, bk_ref, bv_ref,
                q_ref, k_ref, v_ref):
    x = x_ref[...]
    q_ref[...] = jnp.dot(x, wq_ref[...], preferred_element_type=jnp.float32) + bq_ref[...]
    k_ref[...] = jnp.dot(x, wk_ref[...], preferred_element_type=jnp.float32) + bk_ref[...]
    v_ref[...] = jnp.dot(x, wv_ref[...], preferred_element_type=jnp.float32) + bv_ref[...]


def pallas_qkv_proj(x2d, wq, bq, wk, bk, wv, bv, *, tm_max=1024):
    rows, d_in = x2d.shape
    dq, dk, dv = wq.shape[1], wk.shape[1], wv.shape[1]
    tm = min(_round_up(rows, 8), tm_max)

    def w_spec(d):
        return pl.BlockSpec((d_in, d), lambda i: (0, 0))

    def b_spec(d):
        return pl.BlockSpec((1, d), lambda i: (0, 0))

    def o_spec(d):
        return pl.BlockSpec((tm, d), lambda i: (i, 0))

    return pl.pallas_call(
        _qkv_kernel,
        out_shape=(jax.ShapeDtypeStruct((rows, dq), jnp.float32),
                   jax.ShapeDtypeStruct((rows, dk), jnp.float32),
                   jax.ShapeDtypeStruct((rows, dv), jnp.float32)),
        grid=(pl.cdiv(rows, tm),),
        in_specs=[
            pl.BlockSpec((tm, d_in), lambda i: (i, 0)),
            w_spec(dq), w_spec(dk), w_spec(dv),
            b_spec(dq), b_spec(dk), b_spec(dv),
        ],
        out_specs=(o_spec(dq), o_spec(dk), o_spec(dv)),
        compiler_params=pltpu.CompilerParams(
            dimension_semantics=("parallel",),
            vmem_limit_bytes=_VMEM_LIMIT),
    )(x2d.astype(jnp.bfloat16),
      wq.astype(jnp.bfloat16), wk.astype(jnp.bfloat16), wv.astype(jnp.bfloat16),
      bq.reshape(1, dq).astype(jnp.float32),
      bk.reshape(1, dk).astype(jnp.float32),
      bv.reshape(1, dv).astype(jnp.float32))


# ----------------------------------------------------------------------------
# Kernel 3: fused time-delay aggregation + out_projection
#   agg[b, t, c] = sum_i w[b,i] * v[b, (t + d[b,i]) mod L, c]
#   out[b, t, :] = agg[b, t, :] @ Wo + bo
# ----------------------------------------------------------------------------
def _agg_outproj_kernel(delay_ref, weight_ref, v_ref, wo_ref, bo_ref, o_ref):
    # delay_ref : SMEM (B, K) int32 top-k delays per batch element
    # weight_ref: SMEM (B, K) f32 softmaxed weights per batch element
    # v_ref     : (1, L, C) bf16 values of batch b   wo_ref: (C, M) bf16 resident
    # bo_ref    : (1, M) f32 resident                o_ref : (1, L, M) f32
    b = pl.program_id(0)
    L = v_ref.shape[1]
    K = delay_ref.shape[-1]
    t_out = jax.lax.broadcasted_iota(jnp.int32, (L, L), 0)
    t_src = jax.lax.broadcasted_iota(jnp.int32, (L, L), 1)
    a = jnp.zeros((L, L), jnp.float32)
    for i in range(K):  # K = int(factor * log(L)): tiny, static unroll
        d = delay_ref[b, i]
        src = t_out + d
        src = jnp.where(src >= L, src - L, src)      # delays are < L
        a = a + jnp.where(t_src == src, weight_ref[b, i], 0.0)
    # (A @ v)[t, c] = sum_i w_i * v[(t + d_i) mod L, c]
    agg = jnp.dot(a.astype(jnp.bfloat16), v_ref[0],
                  preferred_element_type=jnp.float32)            # (L, C)
    out = jnp.dot(agg.astype(jnp.bfloat16), wo_ref[...],
                  preferred_element_type=jnp.float32)            # (L, M)
    o_ref[0] = out + bo_ref[...]


def pallas_agg_outproj(v_blc, delays, weights, wo, bo):
    """v_blc: (B, L, C); delays: (B, K) int32; weights: (B, K) f32; wo: (C, M)."""
    B, L, C = v_blc.shape
    M = wo.shape[1]
    return pl.pallas_call(
        _agg_outproj_kernel,
        out_shape=jax.ShapeDtypeStruct((B, L, M), jnp.float32),
        grid=(B,),
        in_specs=[
            pl.BlockSpec(memory_space=pltpu.MemorySpace.SMEM),
            pl.BlockSpec(memory_space=pltpu.MemorySpace.SMEM),
            pl.BlockSpec((1, L, C), lambda b: (b, 0, 0)),
            pl.BlockSpec((C, M), lambda b: (0, 0)),              # resident Wo
            pl.BlockSpec((1, M), lambda b: (0, 0)),              # resident bo
        ],
        out_specs=pl.BlockSpec((1, L, M), lambda b: (b, 0, 0)),
        compiler_params=pltpu.CompilerParams(
            dimension_semantics=("parallel",),
            vmem_limit_bytes=_VMEM_LIMIT),
    )(delays.astype(jnp.int32), weights.astype(jnp.float32),
      v_blc.astype(jnp.bfloat16), wo.astype(jnp.bfloat16),
      bo.reshape(1, M).astype(jnp.float32))


# ----------------------------------------------------------------------------
# AutoCorrelationLayer forward
# ----------------------------------------------------------------------------
def auto_correlation_layer(queries, keys, values, attn_mask, params, *,
                           n_heads, factor=1, tm_max=1024):
    """Forward of AutoCorrelationLayer(AutoCorrelation(factor), d_model, n_heads).

    attn_mask is ignored (matching AutoCorrelation). Returns (out, None), as with
    output_attention=False. Uses the inference (eval) aggregation path.
    """
    del attn_mask
    B, L, d_model = queries.shape
    S = keys.shape[1]
    H = n_heads

    # ---- Q/K/V projections. NOTE: Python-identity check can miss the fused
    # path under jit with three equal-but-distinct tracers (still correct).
    if queries is keys and keys is values:
        q2d, k2d, v2d = pallas_qkv_proj(
            queries.reshape(B * L, d_model),
            params["Wq"], params["bq"], params["Wk"], params["bk"],
            params["Wv"], params["bv"], tm_max=tm_max)
        q = q2d.reshape(B, L, H, -1)
        k = k2d.reshape(B, S, H, -1)
        v = v2d.reshape(B, S, H, -1)
    else:
        q = pallas_linear(queries.reshape(B * L, d_model), params["Wq"],
                          params["bq"], tm_max=tm_max).reshape(B, L, H, -1)
        k = pallas_linear(keys.reshape(B * S, d_model), params["Wk"],
                          params["bk"], tm_max=tm_max).reshape(B, S, H, -1)
        v = pallas_linear(values.reshape(B * S, d_model), params["Wv"],
                          params["bv"], tm_max=tm_max).reshape(B, S, H, -1)

    # ---- Align key/value length to L (AutoCorrelation semantics).
    if L > S:
        pad = L - S
        k = jnp.pad(k, ((0, 0), (0, pad), (0, 0), (0, 0)))
        v = jnp.pad(v, ((0, 0), (0, pad), (0, 0), (0, 0)))
    else:
        k = k[:, :L]
        v = v[:, :L]

    # ---- Period-based correlation along the time axis (no transposes needed).
    # TODO(synk): rfft/irfft has no Pallas TPU equivalent; computed in plain JAX.
    q_fft = jnp.fft.rfft(q.astype(jnp.float32), axis=1)
    k_fft = jnp.fft.rfft(k.astype(jnp.float32), axis=1)
    corr = jnp.fft.irfft(q_fft * jnp.conj(k_fft), n=L, axis=1)   # (B, L, H, E)

    # ---- Top-k delays + softmax weights (tiny, data dependent).
    # TODO(synk): per-sample top-k/softmax left in plain JAX (no clean Pallas top-k).
    top_k = int(factor * math.log(L))
    mean_value = jnp.mean(corr, axis=(2, 3))              # (B, L)
    topw, delay = jax.lax.top_k(mean_value, top_k)        # (B, K)
    tmp_corr = jax.nn.softmax(topw, axis=-1)

    # ---- Fused time-delay aggregation + out_projection (Pallas).
    v_flat = v.reshape(B, L, -1)                          # (B, L, H*D), natural layout
    out = pallas_agg_outproj(v_flat, delay, tmp_corr, params["Wo"], params["bo"])
    return out, None


# ----------------------------------------------------------------------------
# Pure-JAX reference (mirrors the PyTorch module, eval mode) + test
# ----------------------------------------------------------------------------
def _ref_forward(queries, keys, values, params, *, n_heads, factor=1):
    B, L, d_model = queries.shape
    S = keys.shape[1]
    H = n_heads
    hp = jax.lax.Precision.HIGHEST

    def lin(x, w, b):
        # Mirror the kernels' numerics policy (bf16 operands, f32 accumulate) so
        # the discrete top-k delay selection is compared under matching precision.
        return jnp.dot(x.astype(jnp.bfloat16), w.astype(jnp.bfloat16),
                       precision=hp, preferred_element_type=jnp.float32) + b

    q = lin(queries.reshape(B * L, d_model), params["Wq"], params["bq"]).reshape(B, L, H, -1)
    k = lin(keys.reshape(B * S, d_model), params["Wk"], params["bk"]).reshape(B, S, H, -1)
    v = lin(values.reshape(B * S, d_model), params["Wv"], params["bv"]).reshape(B, S, H, -1)
    if L > S:
        pad = L - S
        k = jnp.pad(k, ((0, 0), (0, pad), (0, 0), (0, 0)))
        v = jnp.pad(v, ((0, 0), (0, pad), (0, 0), (0, 0)))
    else:
        k = k[:, :L]
        v = v[:, :L]
    qp = jnp.transpose(q, (0, 2, 3, 1))
    kp = jnp.transpose(k, (0, 2, 3, 1))
    vp = jnp.transpose(v, (0, 2, 3, 1))
    corr = jnp.fft.irfft(jnp.fft.rfft(qp, axis=-1) * jnp.conj(jnp.fft.rfft(kp, axis=-1)),
                         n=L, axis=-1)
    top_k = int(factor * math.log(L))
    mean_value = jnp.mean(corr, axis=(1, 2))
    w, d = jax.lax.top_k(mean_value, top_k)
    tc = jax.nn.softmax(w, axis=-1)
    base = jnp.arange(L, dtype=jnp.int32)
    agg = jnp.zeros_like(vp)
    for i in range(top_k):  # time_delay_agg_inference: gather + weighted sum
        idx = (base[None, :] + d[:, i:i + 1]) % L                       # (B, L)
        idx_full = jnp.broadcast_to(idx[:, None, None, :], vp.shape)
        pattern = jnp.take_along_axis(vp, idx_full, axis=-1)
        agg = agg + pattern * tc[:, i][:, None, None, None]
    out = jnp.transpose(agg, (0, 3, 1, 2)).reshape(B * L, -1)
    out = lin(out, params["Wo"], params["bo"])
    return out.reshape(B, L, d_model)


if __name__ == "__main__":
    B, L, S, d_model, n_heads = 2, 16, 8, 32, 4
    d_keys = d_model // n_heads

    key = jax.random.PRNGKey(0)
    kx, kxk, kq, kk, kv, ko, kbq, kbk, kbv, kbo = jax.random.split(key, 10)
    x = jax.random.normal(kx, (B, L, d_model), dtype=jnp.float32)
    x_kv = jax.random.normal(kxk, (B, S, d_model), dtype=jnp.float32)

    def init_w(k_, din, dout):
        return jax.random.normal(k_, (din, dout), dtype=jnp.float32) / math.sqrt(din)

    params = {
        "Wq": init_w(kq, d_model, d_keys * n_heads),
        "bq": jax.random.normal(kbq, (d_keys * n_heads,), jnp.float32) * 0.1,
        "Wk": init_w(kk, d_model, d_keys * n_heads),
        "bk": jax.random.normal(kbk, (d_keys * n_heads,), jnp.float32) * 0.1,
        "Wv": init_w(kv, d_model, d_keys * n_heads),
        "bv": jax.random.normal(kbv, (d_keys * n_heads,), jnp.float32) * 0.1,
        "Wo": init_w(ko, d_keys * n_heads, d_model),
        "bo": jax.random.normal(kbo, (d_model,), jnp.float32) * 0.1,
    }

    tol = dict(atol=3e-2, rtol=3e-2)   # bf16 operands end-to-end (deliberate)

    # 1) Encoder-style self-attention: queries is keys is values -> fused QKV path.
    out, attn = auto_correlation_layer(x, x, x, None, params,
                                       n_heads=n_heads, factor=1)
    jax.block_until_ready(out)
    assert out.shape == (B, L, d_model)
    assert attn is None
    ref = _ref_forward(x, x, x, params, n_heads=n_heads, factor=1)
    err1 = float(jnp.max(jnp.abs(out - ref)))
    assert jnp.allclose(out, ref, **tol), f"self-attn mismatch vs reference: {err1}"

    # 2) Decoder-style cross attention with S < L: separate projections + pad path.
    out2, _ = auto_correlation_layer(x, x_kv, x_kv, None, params,
                                     n_heads=n_heads, factor=1)
    jax.block_until_ready(out2)
    ref2 = _ref_forward(x, x_kv, x_kv, params, n_heads=n_heads, factor=1)
    err2 = float(jnp.max(jnp.abs(out2 - ref2)))
    assert out2.shape == (B, L, d_model)
    assert jnp.allclose(out2, ref2, **tol), f"cross-attn mismatch vs reference: {err2}"

    print("KERNEL_OK")
</pallas_src>

<mosaic_0001>
module attributes {stable_mosaic.version = 11 : i64} {
  func.func @_qkv_kernel(%arg0: i32, %arg1: memref<32x32xbf16, #tpu.memory_space<vmem>>, %arg2: memref<32x32xbf16, #tpu.memory_space<vmem>>, %arg3: memref<32x32xbf16, #tpu.memory_space<vmem>>, %arg4: memref<32x32xbf16, #tpu.memory_space<vmem>>, %arg5: memref<1x32xf32, #tpu.memory_space<vmem>>, %arg6: memref<1x32xf32, #tpu.memory_space<vmem>>, %arg7: memref<1x32xf32, #tpu.memory_space<vmem>>, %arg8: memref<32x32xf32, #tpu.memory_space<vmem>>, %arg9: memref<32x32xf32, #tpu.memory_space<vmem>>, %arg10: memref<32x32xf32, #tpu.memory_space<vmem>>) attributes {dimension_semantics = [#tpu.dimension_semantics<parallel>], iteration_bounds = array<i64: 1>, scalar_prefetch = 0 : i64, scratch_operands = 0 : i64, tpu.core_type = #tpu.core_type<tc>, window_params = [{transform_indices = @transform_0, window_bounds = array<i64: 32, 32>}, {pipeline_mode = #tpu.pipeline_mode<synchronous>, transform_indices = @transform_1, window_bounds = array<i64: 32, 32>}, {pipeline_mode = #tpu.pipeline_mode<synchronous>, transform_indices = @transform_2, window_bounds = array<i64: 32, 32>}, {pipeline_mode = #tpu.pipeline_mode<synchronous>, transform_indices = @transform_3, window_bounds = array<i64: 32, 32>}, {pipeline_mode = #tpu.pipeline_mode<synchronous>, transform_indices = @transform_4, window_bounds = array<i64: 1, 32>}, {pipeline_mode = #tpu.pipeline_mode<synchronous>, transform_indices = @transform_5, window_bounds = array<i64: 1, 32>}, {pipeline_mode = #tpu.pipeline_mode<synchronous>, transform_indices = @transform_6, window_bounds = array<i64: 1, 32>}, {transform_indices = @transform_7, window_bounds = array<i64: 32, 32>}, {transform_indices = @transform_8, window_bounds = array<i64: 32, 32>}, {transform_indices = @transform_9, window_bounds = array<i64: 32, 32>}]} {
    %c0 = arith.constant 0 : index
    %c0_0 = arith.constant 0 : index
    %0 = vector.load %arg1[%c0, %c0_0] : memref<32x32xbf16, #tpu.memory_space<vmem>>, vector<32x32xbf16>
    %c0_1 = arith.constant 0 : index
    %c0_2 = arith.constant 0 : index
    %1 = vector.load %arg2[%c0_1, %c0_2] : memref<32x32xbf16, #tpu.memory_space<vmem>>, vector<32x32xbf16>
    %cst = arith.constant dense<0.000000e+00> : vector<32x32xf32>
    %2 = tpu.matmul %0, %1, %cst {dimension_numbers = #tpu.dot_dimension_numbers<[1], [0], [0], [1], [0, 0, 1, 1], [], []>} : vector<32x32xbf16>, vector<32x32xbf16>, vector<32x32xf32> -> vector<32x32xf32>
    %c0_3 = arith.constant 0 : index
    %c0_4 = arith.constant 0 : index
    %3 = vector.load %arg5[%c0_3, %c0_4] : memref<1x32xf32, #tpu.memory_space<vmem>>, vector<1x32xf32>
    %4 = vector.broadcast %3 : vector<1x32xf32> to vector<32x32xf32>
    %5 = arith.addf %2, %4 : vector<32x32xf32>
    %c0_5 = arith.constant 0 : index
    %c0_6 = arith.constant 0 : index
    %6 = vector.load %arg8[%c0_5, %c0_6] : memref<32x32xf32, #tpu.memory_space<vmem>>, vector<32x32xf32>
    tpu.vector_store %arg8[%c0_5, %c0_6], %5 {strides = array<i32>} : memref<32x32xf32, #tpu.memory_space<vmem>>, vector<32x32xf32>,
    %c0_7 = arith.constant 0 : index
    %c0_8 = arith.constant 0 : index
    %7 = vector.load %arg3[%c0_7, %c0_8] : memref<32x32xbf16, #tpu.memory_space<vmem>>, vector<32x32xbf16>
    %cst_9 = arith.constant dense<0.000000e+00> : vector<32x32xf32>
    %8 = tpu.matmul %0, %7, %cst_9 {dimension_numbers = #tpu.dot_dimension_numbers<[1], [0], [0], [1], [0, 0, 1, 1], [], []>} : vector<32x32xbf16>, vector<32x32xbf16>, vector<32x32xf32> -> vector<32x32xf32>
    %c0_10 = arith.constant 0 : index
    %c0_11 = arith.constant 0 : index
    %9 = vector.load %arg6[%c0_10, %c0_11] : memref<1x32xf32, #tpu.memory_space<vmem>>, vector<1x32xf32>
    %10 = vector.broadcast %9 : vector<1x32xf32> to vector<32x32xf32>
    %11 = arith.addf %8, %10 : vector<32x32xf32>
    %c0_12 = arith.constant 0 : index
    %c0_13 = arith.constant 0 : index
    %12 = vector.load %arg9[%c0_12, %c0_13] : memref<32x32xf32, #tpu.memory_space<vmem>>, vector<32x32xf32>
    tpu.vector_store %arg9[%c0_12, %c0_13], %11 {strides = array<i32>} : memref<32x32xf32, #tpu.memory_space<vmem>>, vector<32x32xf32>,
    %c0_14 = arith.constant 0 : index
    %c0_15 = arith.constant 0 : index
    %13 = vector.load %arg4[%c0_14, %c0_15] : memref<32x32xbf16, #tpu.memory_space<vmem>>, vector<32x32xbf16>
    %cst_16 = arith.constant dense<0.000000e+00> : vector<32x32xf32>
    %14 = tpu.matmul %0, %13, %cst_16 {dimension_numbers = #tpu.dot_dimension_numbers<[1], [0], [0], [1], [0, 0, 1, 1], [], []>} : vector<32x32xbf16>, vector<32x32xbf16>, vector<32x32xf32> -> vector<32x32xf32>
    %c0_17 = arith.constant 0 : index
    %c0_18 = arith.constant 0 : index
    %15 = vector.load %arg7[%c0_17, %c0_18] : memref<1x32xf32, #tpu.memory_space<vmem>>, vector<1x32xf32>
    %16 = vector.broadcast %15 : vector<1x32xf32> to vector<32x32xf32>
    %17 = arith.addf %14, %16 : vector<32x32xf32>
    %c0_19 = arith.constant 0 : index
    %c0_20 = arith.constant 0 : index
    %18 = vector.load %arg10[%c0_19, %c0_20] : memref<32x32xf32, #tpu.memory_space<vmem>>, vector<32x32xf32>
    tpu.vector_store %arg10[%c0_19, %c0_20], %17 {strides = array<i32>} : memref<32x32xf32, #tpu.memory_space<vmem>>, vector<32x32xf32>,
    return
  }
  func.func @transform_0(%arg0: i32) -> (i32, i32) {
    %c0_i32 = arith.constant 0 : i32
    %c0_i32_0 = arith.constant 0 : i32
    return %arg0, %c0_i32 : i32, i32
  }
  func.func @transform_1(%arg0: i32) -> (i32, i32) {
    %c0_i32 = arith.constant 0 : i32
    %c0_i32_0 = arith.constant 0 : i32
    %c0_i32_1 = arith.constant 0 : i32
    return %c0_i32, %c0_i32_0 : i32, i32
  }
  func.func @transform_2(%arg0: i32) -> (i32, i32) {
    %c0_i32 = arith.constant 0 : i32
    %c0_i32_0 = arith.constant 0 : i32
    %c0_i32_1 = arith.constant 0 : i32
    return %c0_i32, %c0_i32_0 : i32, i32
  }
  func.func @transform_3(%arg0: i32) -> (i32, i32) {
    %c0_i32 = arith.constant 0 : i32
    %c0_i32_0 = arith.constant 0 : i32
    %c0_i32_1 = arith.constant 0 : i32
    return %c0_i32, %c0_i32_0 : i32, i32
  }
  func.func @transform_4(%arg0: i32) -> (i32, i32) {
    %c0_i32 = arith.constant 0 : i32
    %c0_i32_0 = arith.constant 0 : i32
    %c0_i32_1 = arith.constant 0 : i32
    return %c0_i32, %c0_i32_0 : i32, i32
  }
  func.func @transform_5(%arg0: i32) -> (i32, i32) {
    %c0_i32 = arith.constant 0 : i32
    %c0_i32_0 = arith.constant 0 : i32
    %c0_i32_1 = arith.constant 0 : i32
    return %c0_i32, %c0_i32_0 : i32, i32
  }
  func.func @transform_6(%arg0: i32) -> (i32, i32) {
    %c0_i32 = arith.constant 0 : i32
    %c0_i32_0 = arith.constant 0 : i32
    %c0_i32_1 = arith.constant 0 : i32
    return %c0_i32, %c0_i32_0 : i32, i32
  }
  func.func @transform_7(%arg0: i32) -> (i32, i32) {
    %c0_i32 = arith.constant 0 : i32
    %c0_i32_0 = arith.constant 0 : i32
    return %arg0, %c0_i32 : i32, i32
  }
  func.func @transform_8(%arg0: i32) -> (i32, i32) {
    %c0_i32 = arith.constant 0 : i32
    %c0_i32_0 = arith.constant 0 : i32
    return %arg0, %c0_i32 : i32, i32
  }
  func.func @transform_9(%arg0: i32) -> (i32, i32) {
    %c0_i32 = arith.constant 0 : i32
    %c0_i32_0 = arith.constant 0 : i32
    return %arg0, %c0_i32 : i32, i32
  }
}

</mosaic_0001>

<bundles_post_ra>
// kernel: tpu_custom_call.1
= control target key start
LH: loop header
LB: loop body
LE: loop exit
PB: predicated region body
PF: predicated region fallthrough
CT: control target
= control target key end

     0   :  { %15 = vsyncpa [#allocation3], 0  ;;  %s836_s0 = inlined_call_operand.hbm [shape: bf16[32,32], index: 0, kind: input, shape index: {}]   ;;  %s837_s1 = inlined_call_operand.hbm [shape: bf16[32,32], index: 1, kind: input, shape index: {}]   ;;  %s838_s2 = inlined_call_operand.hbm [shape: bf16[32,32], index: 2, kind: input, shape index: {}]   ;;  %s839_s3 = inlined_call_operand.hbm [shape: bf16[32,32], index: 3, kind: input, shape index: {}]   ;;  %s840_s4 = inlined_call_operand.vmem [shape: f32[1,32], index: 4, kind: input, shape index: {}]   ;;  %s841_s5 = inlined_call_operand.vmem [shape: f32[1,32], index: 5, kind: input, shape index: {}]   ;;  %s842_s6 = inlined_call_operand.vmem [shape: f32[1,32], index: 6, kind: input, shape index: {}]   ;;  %s843_s7 = inlined_call_operand.hbm [shape: f32[32,32], index: 7, kind: output, shape index: {0}]   ;;  %s844_s8 = inlined_call_operand.hbm [shape: f32[32,32], index: 8, kind: output, shape index: {1}]   ;;  %s845_s9 = inlined_call_operand.hbm [shape: f32[32,32], index: 9, kind: output, shape index: {2}]  }
   0x1   :  { %16 = vsyncpa [#allocation6], 0 }
   0x2   :  { %17 = vsyncpa [#allocation9], 0 }
   0x3   :  { %18 = vsyncpa [#allocation4], 0 }
   0x4   :  { %19 = vsyncpa [#allocation12], 0  ;;  %s622_s30 = smov [#allocation5]   ;;  %s623_s11 = smov [#allocation2]  }
   0x5   :  { %s37_s10 = sshll.u32 %s622_s30, 4  ;;  %s25_s12 = sshll.u32 %s623_s11, 4  ;;  %s38_s10 = int_to_ptr.vmem [resolvable:$true] %s37_s10  ;;  %s683_s12 = int_to_ptr.vmem [resolvable:$true] %s25_s12 }
   0x6   :  { %s458_s15 = scalar_lea.hbm %s837_s1, 256 }
   0x7   :  { %p459_p0 = scmp.ne.s32.totalorder %s837_s1, %s458_s15  ;;  %p462_p1 = scmp.lt.u32.totalorder %s458_s15, %s837_s1 }
   0x9   :  { %p464_p2 = pnand %p462_p1, %p459_p0 }
   0xb   :  { %467 = shalt.err (!%p464_p2)
}
   0xc   :  { %s468_s20 = scalar_lea.vmem %s38_s10, 256  ;;  %p473_p4 = scmp.lt.s32.totalorder %s38_s10, %s38_s10 }
   0xd   :  { %p469_p3 = scmp.ne.s32.totalorder %s38_s10, %s468_s20  ;;  %p474_p5 = scmp.lt.s32.totalorder %s468_s20, %s468_s20 }
   0xf   :  { %p475_p6 = por %p474_p5, %p473_p4 }
  0x11   :  { %p476_p7 = pnand %p475_p6, %p469_p3 }
  0x13   :  { %479 = shalt.err (!%p476_p7)
}
  0x14   :  { %s624_s21 = smov 64   ;;  %s625_s22 = smov 4  }
  0x15   :  { %43 = dma.hbm_to_vmem [thread:$0]  %s837_s1, 256, %s38_s10, [#allocation6], %s624_s21, %s624_s21, %s625_s22  }
  0x16   :  { %s480_s27 = scalar_lea.hbm %s836_s0, 256 }
  0x17   :  { %p481_p8 = scmp.ne.s32.totalorder %s836_s0, %s480_s27  ;;  %p484_p9 = scmp.lt.u32.totalorder %s480_s27, %s836_s0 }
  0x19   :  { %p486_p10 = pnand %p484_p9, %p481_p8 }
  0x1b   :  { %489 = shalt.err (!%p486_p10)
}
  0x1c   :  { %s490_s13 = scalar_lea.vmem %s683_s12, 256  ;;  %p495_p12 = scmp.lt.s32.totalorder %s683_s12, %s683_s12 }
  0x1d   :  { %p491_p11 = scmp.ne.s32.totalorder %s683_s12, %s490_s13  ;;  %p496_p13 = scmp.lt.s32.totalorder %s490_s13, %s490_s13 }
  0x1f   :  { %p497_p0 = por %p496_p13, %p495_p12 }
  0x21   :  { %p498_p1 = pnand %p497_p0, %p491_p11 }
  0x23   :  { %501 = shalt.err (!%p498_p1)
}
  0x24   :  { %31 = dma.hbm_to_vmem [thread:$0]  %s836_s0, 256, %s683_s12, [#allocation3], %s624_s21, %s624_s21, %s625_s22  }
  0x25   :  { %s626_s14 = smov [#allocation7]   ;;  %s627_s16 = smov [#allocation8]  }
  0x26   :  { %s49_s15 = sshll.u32 %s626_s14, 4  ;;  %s61_s17 = sshll.u32 %s627_s16, 4  ;;  %s50_s15 = int_to_ptr.vmem [resolvable:$true] %s49_s15  ;;  %s720_s17 = int_to_ptr.vmem [resolvable:$true] %s61_s17 }
  0x27   :  { %s502_s20 = scalar_lea.hbm %s838_s2, 256 }
  0x28   :  { %p503_p2 = scmp.ne.s32.totalorder %s838_s2, %s502_s20  ;;  %p506_p3 = scmp.lt.u32.totalorder %s502_s20, %s838_s2 }
  0x2a   :  { %p508_p4 = pnand %p506_p3, %p503_p2 }
  0x2c   :  { %511 = shalt.err (!%p508_p4)
}
  0x2d   :  { %s512_s0 = scalar_lea.vmem %s50_s15, 256  ;;  %p517_p6 = scmp.lt.s32.totalorder %s50_s15, %s50_s15 }
  0x2e   :  { %p513_p5 = scmp.ne.s32.totalorder %s50_s15, %s512_s0  ;;  %p518_p7 = scmp.lt.s32.totalorder %s512_s0, %s512_s0 }
  0x30   :  { %p519_p8 = por %p518_p7, %p517_p6 }
  0x32   :  { %p520_p9 = pnand %p519_p8, %p513_p5 }
  0x34   :  { %523 = shalt.err (!%p520_p9)
}
  0x35   :  { %55 = dma.hbm_to_vmem [thread:$0]  %s838_s2, 256, %s50_s15, [#allocation6], %s624_s21, %s624_s21, %s625_s22  }
  0x36   :  { %s524_s30 = scalar_lea.hbm %s839_s3, 256 }
  0x37   :  { %p525_p10 = scmp.ne.s32.totalorder %s839_s3, %s524_s30  ;;  %p528_p11 = scmp.lt.u32.totalorder %s524_s30, %s839_s3 }
  0x39   :  { %p530_p12 = pnand %p528_p11, %p525_p10 }
  0x3b   :  { %533 = shalt.err (!%p530_p12)
}
  0x3c   :  { %s534_s14 = scalar_lea.vmem %s720_s17, 256  ;;  %p539_p0 = scmp.lt.s32.totalorder %s720_s17, %s720_s17 }
  0x3d   :  { %p535_p13 = scmp.ne.s32.totalorder %s720_s17, %s534_s14  ;;  %p540_p1 = scmp.lt.s32.totalorder %s534_s14, %s534_s14 }
  0x3f   :  { %p541_p2 = por %p540_p1, %p539_p0 }
  0x41   :  { %p542_p3 = pnand %p541_p2, %p535_p13 }
  0x43   :  { %545 = shalt.err (!%p542_p3)
}
  0x44   :  { %67 = dma.hbm_to_vmem [thread:$0]  %s839_s3, 256, %s720_s17, [#allocation9], %s624_s21, %s624_s21, %s625_s22  }
  0x45   :  { %612 = dma.done.wait [#allocation3], 256  }
  0x46   :  { %613 = vsyncadd [#allocation3], 4294967040 }
  0x47   :  { %614 = dma.done.wait [#allocation6], 512  }
  0x48   :  { %615 = vsyncadd [#allocation6], 4294966784 }
  0x49   :  { %616 = dma.done.wait [#allocation9], 256  }
  0x4a   :  { %617 = vsyncadd [#allocation9], 4294967040  ;;  %v450_v0 = vld [vmem:[#allocation5] sm:$0xff]   ;;  %v451_v1 = vld [vmem:[#allocation5 + $0x8] sm:$0xff]   ;;  %vm124_vm0 = vcmask 261120   ;;  %s628_s17 = smov [#allocation10]  }
  0x4b   :  { %415 = vmatprep.subr.bf16.mxu0 %v450_v0  ;;  %v452_v2 = vld [vmem:[#allocation7] sm:$0xff]   ;;  %v454_v4 = vld [vmem:[#allocation2 + $0x8] sm:$0xff]   ;;  %v455_v5 = vld [vmem:[#allocation8] sm:$0xff]   ;;  %s341_s18 = sshll.u32 %s628_s17, 4  ;;  %s629_s19 = smov [#allocation11]   ;;  %s342_s18 = int_to_ptr.vmem [resolvable:$true] %s341_s18 }
  0x4c   :  { %416 = vmatpush3.bf16.msra.mxu0 %v450_v0  ;;  %v453_v3 = vld [vmem:[#allocation2] sm:$0xff]   ;;  %423 = vmatprep.subr.bf16.mxu1 %v452_v2  ;;  %v456_v6 = vld [vmem:[#allocation7 + $0x8] sm:$0xff]   ;;  %v457_v7 = vld [vmem:[#allocation8 + $0x8] sm:$0xff]   ;;  %s546_s23 = scalar_lea.vmem %s342_s18, 512  ;;  %p551_p5 = scmp.lt.s32.totalorder %s342_s18, %s342_s18 }
  0x4d   :  { %417 = vmatprep.subr.bf16.mxu0 %v451_v1  ;;  %424 = vmatpush3.bf16.msra.mxu1 %v452_v2  ;;  %v386_v8 = vld [vmem:[%s840_s4] ss:$0 sm:$0xff]  ;;  %s353_s4 = sshll.u32 %s629_s19, 4  ;;  %p547_p4 = scmp.ne.s32.totalorder %s342_s18, %s546_s23  ;;  %s778_s4 = int_to_ptr.vmem [resolvable:$true] %s353_s4 }
  0x4e   :  { %419 = vmatprep.mubr.msk.bf16.mxu0 %vm124_vm0, %v453_v3  ;;  %427 = vmatprep.mubr.msk.bf16.mxu1 %vm124_vm0, %v453_v3  ;;  %v393_v10 = vld [vmem:[%s841_s5] ss:$0 sm:$0xff]  ;;  %p552_p6 = scmp.lt.s32.totalorder %s546_s23, %s546_s23 }
  0x4f   :  { %425 = vmatprep.subr.bf16.mxu1 %v456_v6  ;;  %v398_v26 = vld [vmem:[%s842_s6] ss:$0 sm:$0xff] }
  0x50   :  { %418 = vmatpush3.bf16.msra.mxu0 %v451_v1  ;;  %p553_p7 = por %p552_p6, %p551_p5 }
  0x51   :  { %431 = vmatprep.subr.bf16.mxu0 %v455_v5  ;;  %426 = vmatpush3.bf16.msra.mxu1 %v456_v6 }
  0x52   :  { %p554_p8 = pnand %p553_p7, %p547_p4 }
  0x53   :  { %420 = vmatmul.mubr.msk.bf16.vlgmr.msra.gmra.mrb[0].mxu0 %vm124_vm0, %v454_v4 }
  0x54   :  { %432 = vmatpush3.bf16.msra.mxu0 %v455_v5  ;;  %435 = vmatprep.mubr.msk.bf16.mxu0 %vm124_vm0, %v453_v3 }
  0x55   :  { %433 = vmatprep.subr.bf16.mxu0 %v457_v7  ;;  %428 = vmatmul.mubr.msk.bf16.vlgmr.msra.gmra.mrb[0].mxu1 %vm124_vm0, %v454_v4 }
  0x58   :  { %434 = vmatpush3.bf16.msra.mxu0 %v457_v7 }
  0x5b   :  { %436 = vmatmul.mubr.msk.bf16.vlgmr.msra.gmra.mrb[4].mxu0 %vm124_vm0, %v454_v4 }
 0x126   :  { %v421_v9 = vpop.f32.mrb[0].mxu0 }
 0x127   :  { %v174_v11 = vadd.f32 %v421_v9, %v386_v8  ;;  %v165_v12 = vpop.f32.mrb[1].mxu0 }
 0x128   :  { %v166_v13 = vadd.f32 %v386_v8, %v165_v12  ;;  %v422_v14 = vpop.f32.mrb[2].mxu0  ;;  %v429_v15 = vpop.f32.mrb[0].mxu1 }
 0x129   :  { %182 = vst.msk [vmem:[#allocation10 + $0x10] sm:$0xff] %vm124_vm0, %v174_v11  ;;  %v177_v16 = vadd.f32 %v422_v14, %v386_v8  ;;  %v168_v17 = vpop.f32.mrb[3].mxu0  ;;  %v250_v18 = vadd.f32 %v429_v15, %v393_v10  ;;  %v241_v19 = vpop.f32.mrb[1].mxu1 }
 0x12a   :  { %180 = vst.msk [vmem:[#allocation10] sm:$0xff] %vm124_vm0, %v166_v13  ;;  %v169_v20 = vadd.f32 %v386_v8, %v168_v17  ;;  %v242_v21 = vadd.f32 %v393_v10, %v241_v19  ;;  %v430_v22 = vpop.f32.mrb[2].mxu1 }
 0x12b   :  { %183 = vst.msk [vmem:[#allocation10 + $0x18] sm:$0xff] %vm124_vm0, %v177_v16  ;;  %258 = vst.msk [vmem:[#allocation11 + $0x10] sm:$0xff] %vm124_vm0, %v250_v18  ;;  %v253_v23 = vadd.f32 %v430_v22, %v393_v10  ;;  %v244_v24 = vpop.f32.mrb[3].mxu1 }
 0x12c   :  { %181 = vst.msk [vmem:[#allocation10 + $0x8] sm:$0xff] %vm124_vm0, %v169_v20  ;;  %256 = vst.msk [vmem:[#allocation11] sm:$0xff] %vm124_vm0, %v242_v21  ;;  %v245_v25 = vadd.f32 %v393_v10, %v244_v24 }
 0x12d   :  { %259 = vst.msk [vmem:[#allocation11 + $0x18] sm:$0xff] %vm124_vm0, %v253_v23 }
 0x12e   :  { %557 = shalt.err (!%p554_p8)
}
 0x12f   :  { %s558_s26 = scalar_lea.hbm %s843_s7, 512 }
 0x130   :  { %p559_p9 = scmp.ne.s32.totalorder %s843_s7, %s558_s26  ;;  %p562_p10 = scmp.lt.u32.totalorder %s558_s26, %s843_s7 }
 0x132   :  { %p564_p11 = pnand %p562_p10, %p559_p9 }
 0x134   :  { %567 = shalt.err (!%p564_p11)
}
 0x135   :  { %s630_s28 = smov 128   ;;  %s631_s29 = smov 8   ;;  %257 = vst.msk [vmem:[#allocation11 + $0x8] sm:$0xff] %vm124_vm0, %v245_v25  ;;  %v437_v27 = vpop.f32.mrb[4].mxu0 }
 0x136   :  { %347 = dma.vmem_to_hbm [thread:$0]  %s342_s18, 512, %s843_s7, [#allocation4], %s630_s28, %s630_s28, %s631_s29   ;;  %v326_v28 = vadd.f32 %v437_v27, %v398_v26  ;;  %v317_v29 = vpop.f32.mrb[5].mxu0 }
 0x137   :  { %s632_s13 = smov [#allocation13]   ;;  %s568_s10 = scalar_lea.vmem %s778_s4, 512 }
 0x138   :  { %s365_s1 = sshll.u32 %s632_s13, 4  ;;  %p569_p12 = scmp.ne.s32.totalorder %s778_s4, %s568_s10  ;;  %s366_s1 = int_to_ptr.vmem [resolvable:$true] %s365_s1 }
 0x139   :  { %p573_p13 = scmp.lt.s32.totalorder %s778_s4, %s778_s4  ;;  %p574_p0 = scmp.lt.s32.totalorder %s568_s10, %s568_s10 }
 0x13b   :  { %p575_p1 = por %p574_p0, %p573_p13 }
 0x13d   :  { %p576_p2 = pnand %p575_p1, %p569_p12 }
 0x13f   :  { %579 = shalt.err (!%p576_p2)
}
 0x140   :  { %s580_s15 = scalar_lea.hbm %s844_s8, 512 }
 0x141   :  { %p581_p3 = scmp.ne.s32.totalorder %s844_s8, %s580_s15  ;;  %p584_p4 = scmp.lt.u32.totalorder %s580_s15, %s844_s8 }
 0x143   :  { %p586_p5 = pnand %p584_p4, %p581_p3 }
 0x145   :  { %589 = shalt.err (!%p586_p5)
}
 0x146   :  { %359 = dma.vmem_to_hbm [thread:$0]  %s778_s4, 512, %s844_s8, [#allocation12], %s630_s28, %s630_s28, %s631_s29   ;;  %v318_v30 = vadd.f32 %v398_v26, %v317_v29  ;;  %v438_v31 = vpop.f32.mrb[6].mxu0  ;;  %334 = vst.msk [vmem:[#allocation13 + $0x10] sm:$0xff] %vm124_vm0, %v326_v28 }
 0x147   :  { %v329_v32 = vadd.f32 %v438_v31, %v398_v26  ;;  %v320_v33 = vpop.f32.mrb[7].mxu0  ;;  %s590_s18 = scalar_lea.vmem %s366_s1, 512  ;;  %p595_p7 = scmp.lt.s32.totalorder %s366_s1, %s366_s1 }
 0x148   :  { %332 = vst.msk [vmem:[#allocation13] sm:$0xff] %vm124_vm0, %v318_v30  ;;  %v321_v34 = vadd.f32 %v398_v26, %v320_v33  ;;  %p591_p6 = scmp.ne.s32.totalorder %s366_s1, %s590_s18  ;;  %p596_p8 = scmp.lt.s32.totalorder %s590_s18, %s590_s18 }
 0x149   :  { %335 = vst.msk [vmem:[#allocation13 + $0x18] sm:$0xff] %vm124_vm0, %v329_v32 }
 0x14a   :  { %333 = vst.msk [vmem:[#allocation13 + $0x8] sm:$0xff] %vm124_vm0, %v321_v34  ;;  %p597_p9 = por %p596_p8, %p595_p7 }
 0x14c   :  { %p598_p10 = pnand %p597_p9, %p591_p6 }
 0x14e   :  { %601 = shalt.err (!%p598_p10)
}
 0x14f   :  { %s602_s4 = scalar_lea.hbm %s845_s9, 512 }
 0x150   :  { %p603_p11 = scmp.ne.s32.totalorder %s845_s9, %s602_s4  ;;  %p606_p12 = scmp.lt.u32.totalorder %s602_s4, %s845_s9 }
 0x152   :  { %p608_p13 = pnand %p606_p12, %p603_p11 }
 0x154   :  { %611 = shalt.err (!%p608_p13)
}
 0x155   :  { %371 = dma.vmem_to_hbm [thread:$0]  %s366_s1, 512, %s845_s9, [#allocation12], %s630_s28, %s630_s28, %s631_s29  }
 0x156   :  { %618 = dma.done.wait [#allocation4], 512  }
 0x157   :  { %619 = vsyncadd [#allocation4], 4294966784 }
 0x158   :  { %620 = dma.done.wait [#allocation12], 1024  }
 0x159   :  { %621 = vsyncadd [#allocation12], 4294966272 }
 0x15a   :  { %381 = vsyncpa [#allocation3], 1 }
 0x15b   :  { %382 = vsyncpa [#allocation6], 1 }
 0x15c   :  { %383 = vsyncpa [#allocation9], 1 }
 0x15d   :  { %384 = vsyncpa [#allocation4], 1 }
 0x15e   :  { %385 = vsyncpa [#allocation12], 1 }

</bundles_post_ra>
